<compile_context>
chip_gen: v5e
topology: v5e:2x2
jax: 0.10.0
libtpu: 0.0.40
codegen_flags: <defaults>
</compile_context>

<pallas_src>
import functools

import jax
import jax.numpy as jnp
from jax.experimental import pallas as pl
from jax.experimental.pallas import tpu as pltpu

LANE = 128
SUBLANE = 8
DEFAULT_BLOCK_ROWS = 8192      # (8192, 128) f32 = 4 MiB per input per buffer
CHUNK_ROWS = 512               # rows reduced per fori_loop iteration
VMEM_LIMIT_BYTES = 48 << 20    # fits v5e/v6e (128 MiB) and v7x (64 MiB) VMEM


def _sublane_multiple(*dtypes):
    """Second-minor tiling multiple required by the narrowest HBM dtype."""
    m = SUBLANE
    for dt in dtypes:
        packing = max(1, 4 // max(1, dt.itemsize))   # f32->1, bf16->2, i8/bool->4
        m = max(m, SUBLANE * packing)
    return m


def _dimension_semantics(num_slices):
    """CORE_PARALLEL on v7x (2 TensorCores); safe 'parallel' elsewhere."""
    if num_slices > 1:
        try:
            kind = jax.devices()[0].device_kind.lower()
        except Exception:
            kind = ""
        if hasattr(pltpu, "CORE_PARALLEL") and ("v7" in kind or "7x" in kind):
            return (pltpu.CORE_PARALLEL, pltpu.ARBITRARY)
    return ("parallel", "arbitrary")


def _dice_partial_kernel(x_ref, t_ref, out_ref, *, steps_per_slice, n_blocks,
                         chunk_rows, needs_guard):
    p = pl.program_id(0)   # slice (sharded across cores where supported)
    i = pl.program_id(1)   # reduction step within the slice

    @pl.when(i == 0)
    def _():
        out_ref[...] = jnp.zeros_like(out_ref)

    def fold(v):
        # (rows, 128) -> (8, 128) with pure VPU adds (no per-step XLU reduce).
        r = v.shape[0]
        return v.reshape(r // SUBLANE, SUBLANE, LANE).sum(axis=0)

    def chunk_sums(xs, ts):
        # Cast in VMEM; inputs stay in their native dtype in HBM.
        s = jax.nn.sigmoid(xs.astype(jnp.float32))
        tv = ts.astype(jnp.float32)
        return fold(s * tv), fold(s), fold(tv)

    def accumulate():
        block_rows = x_ref.shape[0]
        n_chunks = block_rows // chunk_rows

        if n_chunks == 1:
            acc_i, acc_s, acc_t = chunk_sums(x_ref[...], t_ref[...])
        else:
            def body(c, carry):
                r0 = pl.multiple_of(c * chunk_rows, chunk_rows)
                ci, cs, ct = chunk_sums(x_ref[pl.ds(r0, chunk_rows), :],
                                        t_ref[pl.ds(r0, chunk_rows), :])
                return (carry[0] + ci, carry[1] + cs, carry[2] + ct)

            zero = jnp.zeros((SUBLANE, LANE), jnp.float32)
            acc_i, acc_s, acc_t = jax.lax.fori_loop(
                0, n_chunks, body, (zero, zero, zero),
                unroll=min(n_chunks, 8))

        out_ref[0, 0, :, :] += acc_i   # sum(sigmoid(x) * t)
        out_ref[0, 1, :, :] += acc_s   # sum(sigmoid(x))
        out_ref[0, 2, :, :] += acc_t   # sum(t)

    if needs_guard:
        # Odd block count split over 2 slices: skip the clamped duplicate block.
        @pl.when(p * steps_per_slice + i < n_blocks)
        def _():
            accumulate()
    else:
        accumulate()


def dice_loss(inputs, targets, smooth=1.0, block_rows=DEFAULT_BLOCK_ROWS):
    x = inputs.reshape(-1)
    t = targets.reshape(-1)
    assert x.shape == t.shape, "inputs and targets must have the same number of elements"
    n = x.shape[0]

    mult = _sublane_multiple(x.dtype, t.dtype)
    block_rows = max(mult, (int(block_rows) // mult) * mult)

    def host_sums(xs, ts):
        s = jax.nn.sigmoid(xs.astype(jnp.float32))
        tt = ts.astype(jnp.float32)
        return jnp.sum(s * tt), jnp.sum(s), jnp.sum(tt)

    main_rows = n // LANE                       # rows of the lane-dense 2-D view
    k_rows = (main_rows // mult) * mult         # rows eligible for the kernel

    if k_rows == 0:
        # Too small for a single (mult, 128) tile: pure host path.
        inter, s_sum, t_sum = host_sums(x, t)
        dice = (2.0 * inter + float(smooth)) / (s_sum + t_sum + float(smooth))
        return 1.0 - dice

    main_elems = main_rows * LANE
    # NOTE: when n % 128 != 0 (rare for NCHW) the prefix slice materializes one
    # copy; the <128-element tail is folded in on the host below.
    x_main = x if main_elems == n else x[:main_elems]
    t_main = t if main_elems == n else t[:main_elems]
    x2 = x_main.reshape(main_rows, LANE)
    t2 = t_main.reshape(main_rows, LANE)

    br = min(block_rows, k_rows)                # multiple of `mult` (or full dim)
    n_blocks = k_rows // br                     # only full blocks go to the kernel
    covered_rows = n_blocks * br                # grid simply never touches the rest

    num_slices = 2 if n_blocks >= 2 else 1
    steps = pl.cdiv(n_blocks, num_slices)
    needs_guard = (num_slices * steps) != n_blocks

    chunk_rows = CHUNK_ROWS if br % CHUNK_ROWS == 0 else br

    def in_index_map(p, i):
        blk = p * steps + i
        if needs_guard:
            blk = jnp.minimum(blk, n_blocks - 1)
        return (blk, 0)

    kernel = functools.partial(
        _dice_partial_kernel,
        steps_per_slice=steps, n_blocks=n_blocks,
        chunk_rows=chunk_rows, needs_guard=needs_guard)

    kernel_elems = covered_rows * LANE
    cost = pl.CostEstimate(
        flops=5 * kernel_elems,
        transcendentals=kernel_elems,
        bytes_accessed=kernel_elems * (x2.dtype.itemsize + t2.dtype.itemsize)
        + num_slices * 3 * SUBLANE * LANE * 4)

    partials = pl.pallas_call(
        kernel,
        out_shape=jax.ShapeDtypeStruct((num_slices, 3, SUBLANE, LANE), jnp.float32),
        grid=(num_slices, steps),
        in_specs=[
            pl.BlockSpec((br, LANE), in_index_map),
            pl.BlockSpec((br, LANE), in_index_map),
        ],
        out_specs=pl.BlockSpec((1, 3, SUBLANE, LANE), lambda p, i: (p, 0, 0, 0)),
        compiler_params=pltpu.CompilerParams(
            dimension_semantics=_dimension_semantics(num_slices),
            vmem_limit_bytes=VMEM_LIMIT_BYTES),
        cost_estimate=cost,
    )(x2, t2)

    # Tiny epilogue: final cross-lane/sublane reduction + dice formula.
    sums = jnp.sum(partials, axis=(0, 2, 3))    # (3,)
    inter, s_sum, t_sum = sums[0], sums[1], sums[2]

    # Rows not covered by full blocks (< br rows) and the <128-element tail.
    if covered_rows < main_rows:
        hi, hs, ht = host_sums(x2[covered_rows:, :], t2[covered_rows:, :])
        inter, s_sum, t_sum = inter + hi, s_sum + hs, t_sum + ht
    if main_elems < n:
        hi, hs, ht = host_sums(x[main_elems:], t[main_elems:])
        inter, s_sum, t_sum = inter + hi, s_sum + hs, t_sum + ht

    dice = (2.0 * inter + float(smooth)) / (s_sum + t_sum + float(smooth))
    return 1.0 - dice


def dice_loss_ref(inputs, targets, smooth=1.0):
    s = jax.nn.sigmoid(inputs.reshape(-1).astype(jnp.float32))
    t = targets.reshape(-1).astype(jnp.float32)
    intersection = jnp.sum(s * t)
    dice = (2.0 * intersection + smooth) / (jnp.sum(s) + jnp.sum(t) + smooth)
    return 1.0 - dice


if __name__ == "__main__":
    key = jax.random.PRNGKey(0)
    k1, k2 = jax.random.split(key)
    # Small shapes consistent with a segmentation head: NCHW = (2, 4, 16, 16)
    inputs = jax.random.normal(k1, (2, 4, 16, 16), dtype=jnp.float32)
    targets = (jax.random.uniform(k2, (2, 4, 16, 16)) > 0.5).astype(jnp.float32)

    out = jax.block_until_ready(dice_loss(inputs, targets, smooth=1.0))
    ref = jax.block_until_ready(dice_loss_ref(inputs, targets, smooth=1.0))

    assert jnp.allclose(out, ref, atol=1e-5, rtol=1e-5), (out, ref)
    print("KERNEL_OK")
</pallas_src>

<mosaic_0001>
module attributes {stable_mosaic.version = 11 : i64} {
  func.func @_dice_partial_kernel(%arg0: i32, %arg1: i32, %arg2: memref<16x128xf32, #tpu.memory_space<vmem>>, %arg3: memref<16x128xf32, #tpu.memory_space<vmem>>, %arg4: memref<1x3x8x128xf32, #tpu.memory_space<vmem>>) attributes {dimension_semantics = [#tpu.dimension_semantics<parallel>, #tpu.dimension_semantics<arbitrary>], iteration_bounds = array<i64: 1, 1>, scalar_prefetch = 0 : i64, scratch_operands = 0 : i64, tpu.core_type = #tpu.core_type<tc>, window_params = [{transform_indices = @transform_0, window_bounds = array<i64: 16, 128>}, {transform_indices = @transform_1, window_bounds = array<i64: 16, 128>}, {transform_indices = @transform_2, window_bounds = array<i64: 1, 3, 8, 128>}]} {
    %c0_i32 = arith.constant 0 : i32
    %0 = arith.cmpi eq, %arg1, %c0_i32 : i32
    %1 = arith.extui %0 : i1 to i32
    %c0_i32_0 = arith.constant 0 : i32
    %2 = arith.cmpi ne, %1, %c0_i32_0 : i32
    scf.if %2 {
      %cst_29 = arith.constant 0.000000e+00 : f32
      %35 = vector.broadcast %cst_29 : f32 to vector<1x3x8x128xf32>
      %c0_30 = arith.constant 0 : index
      %c0_31 = arith.constant 0 : index
      %c0_32 = arith.constant 0 : index
      %c0_33 = arith.constant 0 : index
      %36 = vector.load %arg4[%c0_30, %c0_31, %c0_32, %c0_33] : memref<1x3x8x128xf32, #tpu.memory_space<vmem>>, vector<1x3x8x128xf32>
      tpu.vector_store %arg4[%c0_30, %c0_31, %c0_32, %c0_33], %35 {strides = array<i32>} : memref<1x3x8x128xf32, #tpu.memory_space<vmem>>, vector<1x3x8x128xf32>,
    } else {
    }
    %c0 = arith.constant 0 : index
    %c0_1 = arith.constant 0 : index
    %3 = vector.load %arg2[%c0, %c0_1] : memref<16x128xf32, #tpu.memory_space<vmem>>, vector<16x128xf32>
    %c0_2 = arith.constant 0 : index
    %c0_3 = arith.constant 0 : index
    %4 = vector.load %arg3[%c0_2, %c0_3] : memref<16x128xf32, #tpu.memory_space<vmem>>, vector<16x128xf32>
    %5 = arith.negf %3 : vector<16x128xf32>
    %6 = math.exp %5 : vector<16x128xf32>
    %cst = arith.constant 1.000000e+00 : f32
    %7 = vector.broadcast %cst : f32 to vector<16x128xf32>
    %8 = arith.addf %7, %6 : vector<16x128xf32>
    %9 = arith.divf %7, %8 : vector<16x128xf32>
    %10 = arith.mulf %9, %4 : vector<16x128xf32>
    %11 = vector.shape_cast %10 : vector<16x128xf32> to vector<2x8x128xf32>
    %cst_4 = arith.constant dense<0.000000e+00> : vector<8x128xf32>
    %12 = vector.multi_reduction <add>, %11, %cst_4 [0] : vector<2x8x128xf32> to vector<8x128xf32>
    %13 = vector.shape_cast %9 : vector<16x128xf32> to vector<2x8x128xf32>
    %cst_5 = arith.constant dense<0.000000e+00> : vector<8x128xf32>
    %14 = vector.multi_reduction <add>, %13, %cst_5 [0] : vector<2x8x128xf32> to vector<8x128xf32>
    %15 = vector.shape_cast %4 : vector<16x128xf32> to vector<2x8x128xf32>
    %cst_6 = arith.constant dense<0.000000e+00> : vector<8x128xf32>
    %16 = vector.multi_reduction <add>, %15, %cst_6 [0] : vector<2x8x128xf32> to vector<8x128xf32>
    %c0_7 = arith.constant 0 : index
    %c0_8 = arith.constant 0 : index
    %c0_9 = arith.constant 0 : index
    %c0_10 = arith.constant 0 : index
    %17 = vector.load %arg4[%c0_7, %c0_8, %c0_9, %c0_10] : memref<1x3x8x128xf32, #tpu.memory_space<vmem>>, vector<1x1x8x128xf32>
    %18 = vector.shape_cast %17 : vector<1x1x8x128xf32> to vector<8x128xf32>
    %19 = arith.addf %18, %12 : vector<8x128xf32>
    %c0_11 = arith.constant 0 : index
    %c0_12 = arith.constant 0 : index
    %c0_13 = arith.constant 0 : index
    %c0_14 = arith.constant 0 : index
    %20 = vector.load %arg4[%c0_11, %c0_12, %c0_13, %c0_14] : memref<1x3x8x128xf32, #tpu.memory_space<vmem>>, vector<1x1x8x128xf32>
    %21 = vector.shape_cast %20 : vector<1x1x8x128xf32> to vector<8x128xf32>
    %22 = vector.shape_cast %19 : vector<8x128xf32> to vector<1x1x8x128xf32>
    tpu.vector_store %arg4[%c0_11, %c0_12, %c0_13, %c0_14], %22 {strides = array<i32>} : memref<1x3x8x128xf32, #tpu.memory_space<vmem>>, vector<1x1x8x128xf32>,
    %c0_15 = arith.constant 0 : index
    %c1 = arith.constant 1 : index
    %c0_16 = arith.constant 0 : index
    %c0_17 = arith.constant 0 : index
    %23 = vector.load %arg4[%c0_15, %c1, %c0_16, %c0_17] : memref<1x3x8x128xf32, #tpu.memory_space<vmem>>, vector<1x1x8x128xf32>
    %24 = vector.shape_cast %23 : vector<1x1x8x128xf32> to vector<8x128xf32>
    %25 = arith.addf %24, %14 : vector<8x128xf32>
    %c0_18 = arith.constant 0 : index
    %c1_19 = arith.constant 1 : index
    %c0_20 = arith.constant 0 : index
    %c0_21 = arith.constant 0 : index
    %26 = vector.load %arg4[%c0_18, %c1_19, %c0_20, %c0_21] : memref<1x3x8x128xf32, #tpu.memory_space<vmem>>, vector<1x1x8x128xf32>
    %27 = vector.shape_cast %26 : vector<1x1x8x128xf32> to vector<8x128xf32>
    %28 = vector.shape_cast %25 : vector<8x128xf32> to vector<1x1x8x128xf32>
    tpu.vector_store %arg4[%c0_18, %c1_19, %c0_20, %c0_21], %28 {strides = array<i32>} : memref<1x3x8x128xf32, #tpu.memory_space<vmem>>, vector<1x1x8x128xf32>,
    %c0_22 = arith.constant 0 : index
    %c2 = arith.constant 2 : index
    %c0_23 = arith.constant 0 : index
    %c0_24 = arith.constant 0 : index
    %29 = vector.load %arg4[%c0_22, %c2, %c0_23, %c0_24] : memref<1x3x8x128xf32, #tpu.memory_space<vmem>>, vector<1x1x8x128xf32>
    %30 = vector.shape_cast %29 : vector<1x1x8x128xf32> to vector<8x128xf32>
    %31 = arith.addf %30, %16 : vector<8x128xf32>
    %c0_25 = arith.constant 0 : index
    %c2_26 = arith.constant 2 : index
    %c0_27 = arith.constant 0 : index
    %c0_28 = arith.constant 0 : index
    %32 = vector.load %arg4[%c0_25, %c2_26, %c0_27, %c0_28] : memref<1x3x8x128xf32, #tpu.memory_space<vmem>>, vector<1x1x8x128xf32>
    %33 = vector.shape_cast %32 : vector<1x1x8x128xf32> to vector<8x128xf32>
    %34 = vector.shape_cast %31 : vector<8x128xf32> to vector<1x1x8x128xf32>
    tpu.vector_store %arg4[%c0_25, %c2_26, %c0_27, %c0_28], %34 {strides = array<i32>} : memref<1x3x8x128xf32, #tpu.memory_space<vmem>>, vector<1x1x8x128xf32>,
    return
  }
  func.func @transform_0(%arg0: i32, %arg1: i32) -> (i32, i32) {
    %c1_i32 = arith.constant 1 : i32
    %0 = arith.muli %arg0, %c1_i32 : i32
    %1 = arith.addi %0, %arg1 : i32
    %c0_i32 = arith.constant 0 : i32
    %c0_i32_0 = arith.constant 0 : i32
    return %1, %c0_i32 : i32, i32
  }
  func.func @transform_1(%arg0: i32, %arg1: i32) -> (i32, i32) {
    %c1_i32 = arith.constant 1 : i32
    %0 = arith.muli %arg0, %c1_i32 : i32
    %1 = arith.addi %0, %arg1 : i32
    %c0_i32 = arith.constant 0 : i32
    %c0_i32_0 = arith.constant 0 : i32
    return %1, %c0_i32 : i32, i32
  }
  func.func @transform_2(%arg0: i32, %arg1: i32) -> (i32, i32, i32, i32) {
    %c0_i32 = arith.constant 0 : i32
    %c0_i32_0 = arith.constant 0 : i32
    %c0_i32_1 = arith.constant 0 : i32
    %c0_i32_2 = arith.constant 0 : i32
    return %arg0, %c0_i32, %c0_i32_0, %c0_i32_1 : i32, i32, i32, i32
  }
}

</mosaic_0001>

<bundles_post_ra>
// kernel: tpu_custom_call.1
= control target key start
LH: loop header
LB: loop body
LE: loop exit
PB: predicated region body
PF: predicated region fallthrough
CT: control target
= control target key end

     0   :  { %7 = vsyncpa [#allocation3], 0  ;;  %s273_s0 = inlined_call_operand.hbm [shape: f32[16,128], index: 0, kind: input, shape index: {}]   ;;  %s274_s1 = inlined_call_operand.hbm [shape: f32[16,128], index: 1, kind: input, shape index: {}]   ;;  %s275_s2 = inlined_call_operand.hbm [shape: f32[1,3,8,128], index: 2, kind: output, shape index: {}]  }
   0x1   :  { %8 = vsyncpa [#allocation6], 0 }
   0x2   :  { %9 = vsyncpa [#allocation4], 0  ;;  %s18_s11 = sshll.u32 %s273_s0, 4  ;;  %s235_s12 = smov [#allocation2]   ;;  %s19_s11 = int_to_ptr.hbm [resolvable:$true] %s18_s11 }
   0x3   :  { %s20_s13 = sshll.u32 %s235_s12, 4  ;;  %s35_s16 = sshll.u32 %s274_s1, 4  ;;  %s21_s13 = int_to_ptr.vmem [resolvable:$true] %s20_s13  ;;  %s36_s16 = int_to_ptr.hbm [resolvable:$true] %s35_s16 }
   0x4   :  { %s236_s17 = smov 128   ;;  %s237_s18 = smov 8  }
   0x5   :  { %26 = dma.hbm_to_vmem [thread:$0]  %s19_s11, 256, %s21_s13, [#allocation3], %s236_s17, %s236_s17, %s237_s18  }
   0x6   :  { %s238_s19 = smov [#allocation5]  }
   0x7   :  { %s37_s20 = sshll.u32 %s238_s19, 4  ;;  %s38_s20 = int_to_ptr.vmem [resolvable:$true] %s37_s20 }
   0x8   :  { %43 = dma.hbm_to_vmem [thread:$0]  %s36_s16, 256, %s38_s20, [#allocation6], %s236_s17, %s236_s17, %s237_s18  }
   0x9   :  { %229 = dma.done.wait [#allocation3], 256  }
   0xa   :  { %230 = vsyncadd [#allocation3], 4294967040 }
   0xb   :  { %231 = dma.done.wait [#allocation6], 256  }
   0xc   :  { %232 = vsyncadd [#allocation6], 4294967040  ;;  %v63_v0 = vld [vmem:[#allocation2] sm:$0xff]  ;;  %v64_v1 = vld [vmem:[#allocation2 + $0x8] sm:$0xff]  ;;  %s239_s0 = smov [#allocation7]   ;;  %s127_s23 = sshll.u32 %s275_s2, 4  ;;  %s128_s23 = int_to_ptr.hbm [resolvable:$true] %s127_s23 }
   0xd   :  { %v65_v2 = vld [vmem:[#allocation5] sm:$0xff]  ;;  %v66_v3 = vld [vmem:[#allocation5 + $0x8] sm:$0xff]  ;;  %v141_v4 = vmul.f32 -1.442695, %v63_v0  ;;  %v142_v5 = vmul.f32 -1.442695, %v64_v1 }
   0xe   :  { %v109_v6 = vadd.f32 %v66_v3, %v65_v2  ;;  %s125_s1 = sshll.u32 %s239_s0, 4  ;;  %s126_s1 = int_to_ptr.vmem [resolvable:$true] %s125_s1 }
   0xf   :  { %149 = vpow2.f32 %v141_v4 }
  0x10   :  { %151 = vpow2.f32 %v142_v5  ;;  %120 = vst [vmem:[#allocation7 + $0x10] sm:$0xff] %v109_v6 }
  0x15   :  { %v150_v7 = vpop.eup %149 }
  0x16   :  { %v152_v8 = vpop.eup %151  ;;  %v73_v9 = vadd.f32 1.0, %v150_v7 }
  0x17   :  { %v74_v10 = vadd.f32 1.0, %v152_v8 }
  0x18   :  { %153 = vrcp.f32 %v73_v9  ;;  %vm80_vm0 = vweird.f32 %v73_v9  ;;  %v86_v14 = vand.u32 2147483648, %v73_v9  ;;  %v84_v17 = vand.u32 2147483647, %v73_v9 }
  0x19   :  { %155 = vrcp.f32 %v74_v10  ;;  %v101_v18 = vand.u32 2147483648, %v74_v10  ;;  %vm95_vm2 = vweird.f32 %v74_v10  ;;  %v99_v20 = vand.u32 2147483647, %v74_v10 }
  0x1a   :  { %v87_v22 = vor.u32 1.1754944e-38, %v86_v14  ;;  %vm85_vm5 = vcmp.eq.f32.partialorder %v84_v17, 8.507059e+37 }
  0x1b   :  { %v102_v25 = vor.u32 1.1754944e-38, %v101_v18  ;;  %vm100_vm7 = vcmp.eq.f32.partialorder %v99_v20, 8.507059e+37 }
  0x1e   :  { %v154_v11 = vpop.eup %153 }
  0x1f   :  { %v156_v12 = vpop.eup %155  ;;  %v76_v13 = vmul.f32 %v154_v11, %v73_v9  ;;  %vm81_vm1 = vweird.f32 %v154_v11 }
  0x20   :  { %v91_v15 = vmul.f32 %v156_v12, %v74_v10  ;;  %vm96_vm3 = vweird.f32 %v156_v12  ;;  %vm82_vm4 = vmor %vm80_vm0, %vm81_vm1 }
  0x21   :  { %v77_v16 = vsub.f32 1.0, %v76_v13  ;;  %vm97_vm6 = vmor %vm95_vm2, %vm96_vm3 }
  0x22   :  { %v92_v19 = vsub.f32 1.0, %v91_v15 }
  0x23   :  { %v78_v21 = vmul.f32 %v154_v11, %v77_v16 }
  0x24   :  { %v93_v23 = vmul.f32 %v156_v12, %v92_v19 }
  0x25   :  { %v79_v24 = vadd.f32 %v154_v11, %v78_v21 }
  0x26   :  { %v94_v26 = vadd.f32 %v156_v12, %v93_v23 }
  0x27   :  { %v83_v27 = vsel %vm82_vm4, %v154_v11, %v79_v24 }
  0x28   :  { %v88_v28 = vsel %vm85_vm5, %v87_v22, %v83_v27  ;;  %v98_v29 = vsel %vm97_vm6, %v156_v12, %v94_v26 }
  0x29   :  { %v103_v30 = vsel %vm100_vm7, %v102_v25, %v98_v29  ;;  %v105_v31 = vmul.f32 %v88_v28, %v65_v2 }
  0x2a   :  { %v106_v32 = vmul.f32 %v103_v30, %v66_v3  ;;  %v108_v33 = vadd.f32 %v103_v30, %v88_v28 }
  0x2c   :  { %v107_v34 = vadd.f32 %v106_v32, %v105_v31  ;;  %116 = vst [vmem:[#allocation7 + $0x8] sm:$0xff] %v108_v33 }
  0x2e   :  { %112 = vst [vmem:[#allocation7] sm:$0xff] %v107_v34 }
  0x2f   :  { %133 = dma.vmem_to_hbm [thread:$0]  %s126_s1, 384, %s128_s23, [#allocation4], %s236_s17, %s236_s17, %s237_s18  }
  0x30   :  { %233 = dma.done.wait [#allocation4], 384  }
  0x31   :  { %234 = vsyncadd [#allocation4], 4294966912 }
  0x32   :  { %138 = vsyncpa [#allocation3], 1 }
  0x33   :  { %139 = vsyncpa [#allocation6], 1 }
  0x34   :  { %140 = vsyncpa [#allocation4], 1 }

</bundles_post_ra>
